<compile_context>
chip_gen: v7x
topology: tpu7x:2x2x1
jax: 0.10.0
libtpu: 0.0.40
codegen_flags: <defaults>
</compile_context>

<pallas_src>
import functools

import jax
import jax.numpy as jnp
from jax.experimental import pallas as pl
from jax.experimental.pallas import tpu as pltpu

EPSILON = 1e-5
MOMENTUM = 0.9

# Per-block byte budget for x / y blocks (input + output are double-buffered by
# the pipeline, so worst case ~4x this) and the explicit scoped-VMEM request.
# 48 MiB stays inside v7x's 64 MiB physical VMEM and well inside v5e/v6e's 128.
BLOCK_BYTES = 8 * 1024 * 1024
VMEM_LIMIT_BYTES = 48 * 1024 * 1024


# ---------------------------------------------------------------------------
# tile selection helpers
# ---------------------------------------------------------------------------
def _round_down(v, m):
    return (v // m) * m


def _round_up(v, m):
    return ((v + m - 1) // m) * m


def _sublane_align(dtype):
    """Sublane packing for the dtype: 8 (f32), 16 (bf16), 32 (int8/fp8)."""
    return max(8, 32 // jnp.dtype(dtype).itemsize)


def _lane_tile(extent, rows, itemsize, block_bytes):
    """Lane-axis tile: the full extent if it fits the per-block byte budget,
    otherwise the largest multiple of 128 that does (floor 128)."""
    budget = block_bytes // max(rows * itemsize, 1)
    if extent <= budget:
        return extent
    return min(extent, max(128, _round_down(budget, 128)))


# ---------------------------------------------------------------------------
# kernels
# ---------------------------------------------------------------------------
def _bn_fused_kernel_4d(x_ref, gamma_ref, beta_ref, mm_ref, mv_ref,
                        y_ref, new_mm_ref, new_mv_ref, *, inv_m):
    """Single pass: slab (N, c_t, HW) resident -> stats + normalize + stats out."""
    x = x_ref[...].astype(jnp.float32)                 # (N, c_t, HW)
    s_n = jnp.sum(x, axis=0)                           # (c_t, HW)
    sq_n = jnp.sum(x * x, axis=0)                      # (c_t, HW)
    mean = jnp.sum(s_n, axis=1, keepdims=True) * inv_m     # (c_t, 1)
    var = jnp.sum(sq_n, axis=1, keepdims=True) * inv_m - mean * mean
    # Reference divides by (var + eps) WITHOUT sqrt -- reproduced exactly.
    inv = 1.0 / (var + EPSILON)
    scale = gamma_ref[...] * inv                       # (c_t, 1)
    shift = beta_ref[...] - mean * scale
    y_ref[...] = (x * scale + shift).astype(y_ref.dtype)
    new_mm_ref[...] = (1.0 - MOMENTUM) * mean + MOMENTUM * mm_ref[...]
    new_mv_ref[...] = (1.0 - MOMENTUM) * var + MOMENTUM * mv_ref[...]


def _bn_fused_kernel_2d(x_ref, gamma_ref, beta_ref, mm_ref, mv_ref,
                        y_ref, new_mm_ref, new_mv_ref, *, inv_m):
    """Single pass for (N, C): block (N, c_t) resident."""
    x = x_ref[...].astype(jnp.float32)                 # (N, c_t)
    mean = jnp.sum(x, axis=0, keepdims=True) * inv_m   # (1, c_t)
    var = jnp.sum(x * x, axis=0, keepdims=True) * inv_m - mean * mean
    inv = 1.0 / (var + EPSILON)
    scale = gamma_ref[...] * inv
    shift = beta_ref[...] - mean * scale
    y_ref[...] = (x * scale + shift).astype(y_ref.dtype)
    new_mm_ref[...] = (1.0 - MOMENTUM) * mean + MOMENTUM * mm_ref[...]
    new_mv_ref[...] = (1.0 - MOMENTUM) * var + MOMENTUM * mv_ref[...]


def _bn_stats_kernel(x_ref, gamma_ref, beta_ref, mm_ref, mv_ref,
                     scale_ref, shift_ref, new_mm_ref, new_mv_ref,
                     acc_sum, acc_sq, *, reduce_axis, reduce_grid_axis,
                     reduce_extent, reduce_tile, inv_m):
    """Pass 1 (streaming path): accumulate per-channel sum/sumsq over the
    reduction grid axes; on the last step fold gamma/(var+eps) into per-channel
    scale/shift and emit updated moving statistics.

    4-D: x block (c_t, hw_t), reduce_axis=1 (lane), tiled by grid axis 2.
    2-D: x block (n_t, c_t), reduce_axis=0 (sublane), tiled by grid axis 1.
    Grid is (C_tiles, ax1, ax2); axes 1 and 2 together form the reduction.
    """
    ri = pl.program_id(1)
    si = pl.program_id(2)

    @pl.when(jnp.logical_and(ri == 0, si == 0))
    def _():
        acc_sum[...] = jnp.zeros_like(acc_sum)
        acc_sq[...] = jnp.zeros_like(acc_sq)

    x = x_ref[...].astype(jnp.float32)
    if reduce_extent % reduce_tile != 0:
        # Mask the out-of-range tail of the partial reduction tile.
        step = pl.program_id(reduce_grid_axis)
        pos = jax.lax.broadcasted_iota(jnp.int32, x.shape, reduce_axis)
        x = jnp.where(pos < (reduce_extent - step * reduce_tile), x, 0.0)

    acc_sum[...] += jnp.sum(x, axis=reduce_axis, keepdims=True)
    acc_sq[...] += jnp.sum(x * x, axis=reduce_axis, keepdims=True)

    @pl.when(jnp.logical_and(ri == pl.num_programs(1) - 1,
                             si == pl.num_programs(2) - 1))
    def _():
        mean = acc_sum[...] * inv_m
        var = acc_sq[...] * inv_m - mean * mean
        inv = 1.0 / (var + EPSILON)          # no sqrt, matching the reference
        scale = gamma_ref[...] * inv
        scale_ref[...] = scale
        shift_ref[...] = beta_ref[...] - mean * scale
        new_mm_ref[...] = (1.0 - MOMENTUM) * mean + MOMENTUM * mm_ref[...]
        new_mv_ref[...] = (1.0 - MOMENTUM) * var + MOMENTUM * mv_ref[...]


def _bn_norm_kernel(x_ref, scale_ref, shift_ref, y_ref):
    """Pass 2: y = x * scale + shift (scale/shift broadcast per channel)."""
    x = x_ref[...].astype(jnp.float32)
    y_ref[...] = (x * scale_ref[...] + shift_ref[...]).astype(y_ref.dtype)


# ---------------------------------------------------------------------------
# pallas_call builders
# ---------------------------------------------------------------------------
def _bn_stats_call(x, gamma, beta, mm, mv, *, grid, x_spec, p_spec, acc_shape,
                   reduce_axis, reduce_grid_axis, reduce_extent, reduce_tile,
                   inv_m, stat_shape):
    kernel = functools.partial(
        _bn_stats_kernel, reduce_axis=reduce_axis,
        reduce_grid_axis=reduce_grid_axis, reduce_extent=reduce_extent,
        reduce_tile=reduce_tile, inv_m=inv_m)
    stat = jax.ShapeDtypeStruct(stat_shape, jnp.float32)
    return pl.pallas_call(
        kernel,
        out_shape=(stat, stat, stat, stat),
        grid_spec=pltpu.PrefetchScalarGridSpec(
            num_scalar_prefetch=0,
            grid=grid,
            in_specs=[x_spec, p_spec, p_spec, p_spec, p_spec],
            out_specs=(p_spec, p_spec, p_spec, p_spec),
            scratch_shapes=[pltpu.VMEM(acc_shape, jnp.float32),
                            pltpu.VMEM(acc_shape, jnp.float32)]),
        compiler_params=pltpu.CompilerParams(
            dimension_semantics=("parallel", "arbitrary", "arbitrary"),
            vmem_limit_bytes=VMEM_LIMIT_BYTES),
    )(x, gamma, beta, mm, mv)


def _bn_norm_call(x, scale, shift, *, grid, x_spec, p_spec):
    return pl.pallas_call(
        _bn_norm_kernel,
        out_shape=jax.ShapeDtypeStruct(x.shape, x.dtype),
        grid_spec=pltpu.PrefetchScalarGridSpec(
            num_scalar_prefetch=0,
            grid=grid,
            in_specs=[x_spec, p_spec, p_spec],
            out_specs=x_spec),
        compiler_params=pltpu.CompilerParams(
            dimension_semantics=("parallel", "parallel", "parallel"),
            vmem_limit_bytes=VMEM_LIMIT_BYTES),
    )(x, scale, shift)


def _bn_fused_call(kernel_fn, x, gamma, beta, mm, mv, *, grid, x_spec, p_spec,
                   stat_shape, inv_m):
    stat = jax.ShapeDtypeStruct(stat_shape, jnp.float32)
    return pl.pallas_call(
        functools.partial(kernel_fn, inv_m=inv_m),
        out_shape=(jax.ShapeDtypeStruct(x.shape, x.dtype), stat, stat),
        grid_spec=pltpu.PrefetchScalarGridSpec(
            num_scalar_prefetch=0,
            grid=grid,
            in_specs=[x_spec, p_spec, p_spec, p_spec, p_spec],
            out_specs=(x_spec, p_spec, p_spec)),
        compiler_params=pltpu.CompilerParams(
            dimension_semantics=("parallel",),
            vmem_limit_bytes=VMEM_LIMIT_BYTES),
    )(x, gamma, beta, mm, mv)


# ---------------------------------------------------------------------------
# jitted functional forwards (pure; mutation stays in the class)
# ---------------------------------------------------------------------------
@functools.partial(jax.jit, static_argnames=("block_bytes",))
def _bn_forward_4d(x, gamma, beta, mm, mv, block_bytes=BLOCK_BYTES):
    n, c, h, w = x.shape
    hw = h * w
    x3 = x.reshape(n, c, hw)                     # minor-dim merge, no transpose
    itemsize = jnp.dtype(x.dtype).itemsize
    align_c = _sublane_align(x.dtype)
    inv_m = 1.0 / float(n * hw)

    g = gamma.reshape(c, 1).astype(jnp.float32)
    b = beta.reshape(c, 1).astype(jnp.float32)
    mm1 = mm.reshape(c, 1).astype(jnp.float32)
    mv1 = mv.reshape(c, 1).astype(jnp.float32)

    # ------ fused single-pass path: slab (N, c_t, HW) kept resident in VMEM
    slab_bytes = n * hw * itemsize               # bytes per channel
    budget_ct = block_bytes // max(slab_bytes, 1)
    fused_ct = None
    if c <= budget_ct:
        fused_ct = c
        if c >= 2 * align_c:                     # expose >=2 tiles for v7x 2-TC
            half = _round_up(pl.cdiv(c, 2), align_c)
            if half < c:
                fused_ct = half
    elif budget_ct >= align_c:
        fused_ct = min(c, _round_down(budget_ct, align_c))

    if fused_ct is not None:
        grid = (pl.cdiv(c, fused_ct),)
        x_spec = pl.BlockSpec((n, fused_ct, hw), lambda ci: (0, ci, 0))
        p_spec = pl.BlockSpec((fused_ct, 1), lambda ci: (ci, 0))
        y3, new_mm, new_mv = _bn_fused_call(
            _bn_fused_kernel_4d, x3, g, b, mm1, mv1,
            grid=grid, x_spec=x_spec, p_spec=p_spec,
            stat_shape=(c, 1), inv_m=inv_m)
        return (y3.reshape(n, c, h, w),
                new_mm.reshape(1, c, 1, 1), new_mv.reshape(1, c, 1, 1))

    # ------ two-pass streaming path (slab does not fit the block budget)
    rows_full_hw = block_bytes // max(hw * itemsize, 1)
    if rows_full_hw >= align_c:
        c_t = min(c, _round_down(rows_full_hw, align_c))
    else:
        c_t = min(c, align_c)
    if c_t == c and c >= 2 * align_c:            # keep the stats pass 2-TC wide
        half = _round_up(pl.cdiv(c, 2), align_c)
        if half < c:
            c_t = half
    hw_t = _lane_tile(hw, c_t, itemsize, block_bytes)

    grid = (pl.cdiv(c, c_t), n, pl.cdiv(hw, hw_t))
    x_spec = pl.BlockSpec((None, c_t, hw_t), lambda ci, ni, hi: (ni, ci, hi))
    p_spec = pl.BlockSpec((c_t, 1), lambda ci, ni, hi: (ci, 0))

    scale, shift, new_mm, new_mv = _bn_stats_call(
        x3, g, b, mm1, mv1,
        grid=grid, x_spec=x_spec, p_spec=p_spec,
        acc_shape=(c_t, 1), reduce_axis=1, reduce_grid_axis=2,
        reduce_extent=hw, reduce_tile=hw_t, inv_m=inv_m, stat_shape=(c, 1))

    y3 = _bn_norm_call(x3, scale, shift, grid=grid, x_spec=x_spec, p_spec=p_spec)
    return (y3.reshape(n, c, h, w),
            new_mm.reshape(1, c, 1, 1), new_mv.reshape(1, c, 1, 1))


@functools.partial(jax.jit, static_argnames=("block_bytes",))
def _bn_forward_2d(x, gamma, beta, mm, mv, block_bytes=BLOCK_BYTES):
    n, c = x.shape
    itemsize = jnp.dtype(x.dtype).itemsize
    align_n = _sublane_align(x.dtype)
    inv_m = 1.0 / float(n)

    g = gamma.reshape(1, c).astype(jnp.float32)
    b = beta.reshape(1, c).astype(jnp.float32)
    mm1 = mm.reshape(1, c).astype(jnp.float32)
    mv1 = mv.reshape(1, c).astype(jnp.float32)

    # ------ fused single-pass path: block (N, c_t) kept resident in VMEM
    col_bytes = n * itemsize
    budget_ct = block_bytes // max(col_bytes, 1)
    fused_ct = None
    if c <= budget_ct:
        fused_ct = c
        if c >= 2 * 128:                         # >=2 lane tiles for v7x 2-TC
            half = _round_up(pl.cdiv(c, 2), 128)
            if half < c:
                fused_ct = half
    elif budget_ct >= 128:
        fused_ct = min(c, _round_down(budget_ct, 128))

    if fused_ct is not None:
        grid = (pl.cdiv(c, fused_ct),)
        x_spec = pl.BlockSpec((n, fused_ct), lambda ci: (0, ci))
        p_spec = pl.BlockSpec((1, fused_ct), lambda ci: (0, ci))
        y, new_mm, new_mv = _bn_fused_call(
            _bn_fused_kernel_2d, x, g, b, mm1, mv1,
            grid=grid, x_spec=x_spec, p_spec=p_spec,
            stat_shape=(1, c), inv_m=inv_m)
        return y, new_mm, new_mv

    # ------ two-pass streaming path: tile both N (sublane) and C (lane)
    c_t = _lane_tile(c, align_n, itemsize, block_bytes)
    if n * c_t * itemsize <= block_bytes:
        n_t = n
    else:
        n_t = min(n, max(align_n, _round_down(
            block_bytes // max(c_t * itemsize, 1), align_n)))

    grid = (pl.cdiv(c, c_t), pl.cdiv(n, n_t), 1)
    x_spec = pl.BlockSpec((n_t, c_t), lambda ci, ni, hi: (ni, ci))
    p_spec = pl.BlockSpec((1, c_t), lambda ci, ni, hi: (0, ci))

    scale, shift, new_mm, new_mv = _bn_stats_call(
        x, g, b, mm1, mv1,
        grid=grid, x_spec=x_spec, p_spec=p_spec,
        acc_shape=(1, c_t), reduce_axis=0, reduce_grid_axis=1,
        reduce_extent=n, reduce_tile=n_t, inv_m=inv_m, stat_shape=(1, c))

    y = _bn_norm_call(x, scale, shift, grid=grid, x_spec=x_spec, p_spec=p_spec)
    return y, new_mm, new_mv


# ---------------------------------------------------------------------------
# module wrapper (keeps the PyTorch module's stateful semantics)
# ---------------------------------------------------------------------------
class BatchNormal:
    """JAX/Pallas port of the PyTorch BatchNormal module (training forward)."""

    def __init__(self, in_channel, num_dims):
        assert num_dims in (2, 4)
        shape = (1, in_channel) if num_dims == 2 else (1, in_channel, 1, 1)
        self.num_dims = num_dims
        self.in_channel = in_channel
        self.gamma = jnp.ones(shape, dtype=jnp.float32)
        self.beta = jnp.zeros(shape, dtype=jnp.float32)
        self.moving_mean = jnp.zeros(shape, dtype=jnp.float32)
        self.moving_var = jnp.zeros(shape, dtype=jnp.float32)

    def __call__(self, x):
        assert x.shape[1] == self.in_channel
        if self.num_dims == 4:
            y, new_mm, new_mv = _bn_forward_4d(
                x, self.gamma, self.beta, self.moving_mean, self.moving_var,
                block_bytes=BLOCK_BYTES)
        else:
            y, new_mm, new_mv = _bn_forward_2d(
                x, self.gamma, self.beta, self.moving_mean, self.moving_var,
                block_bytes=BLOCK_BYTES)
        # Mirrors the PyTorch module's in-place stat update (not jit-friendly).
        self.moving_mean = new_mm
        self.moving_var = new_mv
        return y


# ---------------------------------------------------------------------------
# pure-JAX references of the exact PyTorch training-path semantics
# ---------------------------------------------------------------------------
def _reference_batch_norm_4d(x, gamma, beta, moving_mean, moving_var):
    x_mean = jnp.mean(x, axis=(0, 2, 3), keepdims=True)
    x_var = jnp.mean((x - x_mean) ** 2, axis=(0, 2, 3), keepdims=True)
    x_hat = (x - x_mean) / (x_var + EPSILON)        # no sqrt, as in the source
    y = gamma * x_hat + beta
    new_mm = (1 - MOMENTUM) * x_mean + MOMENTUM * moving_mean
    new_mv = (1 - MOMENTUM) * x_var + MOMENTUM * moving_var
    return y, new_mm, new_mv


def _reference_batch_norm_2d(x, gamma, beta, moving_mean, moving_var):
    x_mean = jnp.mean(x, axis=0, keepdims=True)
    x_var = jnp.mean((x - x_mean) ** 2, axis=0, keepdims=True)
    x_hat = (x - x_mean) / (x_var + EPSILON)
    y = gamma * x_hat + beta
    new_mm = (1 - MOMENTUM) * x_mean + MOMENTUM * moving_mean
    new_mv = (1 - MOMENTUM) * x_var + MOMENTUM * moving_var
    return y, new_mm, new_mv


if __name__ == "__main__":
    key = jax.random.PRNGKey(0)
    k1, k2, k3, k4 = jax.random.split(key, 4)

    # ---- 4-D path via the module (fused single-pass kernel) ----
    N, C, H, W = 2, 4, 16, 16
    x = jax.random.normal(k1, (N, C, H, W), dtype=jnp.float32)
    bn = BatchNormal(in_channel=C, num_dims=4)
    y = jax.block_until_ready(bn(x))
    ones4 = jnp.ones((1, C, 1, 1), jnp.float32)
    zeros4 = jnp.zeros((1, C, 1, 1), jnp.float32)
    y_ref, mm_ref, mv_ref = _reference_batch_norm_4d(x, ones4, zeros4, zeros4, zeros4)
    assert jnp.allclose(y, y_ref, atol=1e-4, rtol=1e-4)
    assert jnp.allclose(bn.moving_mean, mm_ref, atol=1e-5, rtol=1e-5)
    assert jnp.allclose(bn.moving_var, mv_ref, atol=1e-5, rtol=1e-5)

    # ---- 4-D two-pass streaming path with a masked partial HW tile ----
    xb = jax.random.normal(k2, (2, 4, 18, 10), dtype=jnp.float32)
    yb, mmb, mvb = _bn_forward_4d(xb, ones4, zeros4, zeros4, zeros4,
                                  block_bytes=2048)
    jax.block_until_ready(yb)
    yb_ref, mmb_ref, mvb_ref = _reference_batch_norm_4d(xb, ones4, zeros4, zeros4, zeros4)
    assert jnp.allclose(yb, yb_ref, atol=1e-4, rtol=1e-4)
    assert jnp.allclose(mmb, mmb_ref, atol=1e-5, rtol=1e-5)
    assert jnp.allclose(mvb, mvb_ref, atol=1e-5, rtol=1e-5)

    # ---- 2-D path via the module (fused single-pass kernel) ----
    x2 = jax.random.normal(k3, (8, 32), dtype=jnp.float32)
    bn2 = BatchNormal(in_channel=32, num_dims=2)
    y2 = jax.block_until_ready(bn2(x2))
    ones2 = jnp.ones((1, 32), jnp.float32)
    zeros2 = jnp.zeros((1, 32), jnp.float32)
    y2_ref, mm2_ref, mv2_ref = _reference_batch_norm_2d(x2, ones2, zeros2, zeros2, zeros2)
    assert jnp.allclose(y2, y2_ref, atol=1e-4, rtol=1e-4)
    assert jnp.allclose(bn2.moving_mean, mm2_ref, atol=1e-5, rtol=1e-5)
    assert jnp.allclose(bn2.moving_var, mv2_ref, atol=1e-5, rtol=1e-5)

    # ---- 2-D two-pass streaming path with a masked partial N tile ----
    C2 = 256
    x2b = jax.random.normal(k4, (10, C2), dtype=jnp.float32)
    ones2b = jnp.ones((1, C2), jnp.float32)
    zeros2b = jnp.zeros((1, C2), jnp.float32)
    y2b, mm2b, mv2b = _bn_forward_2d(x2b, ones2b, zeros2b, zeros2b, zeros2b,
                                     block_bytes=2048)
    jax.block_until_ready(y2b)
    y2b_ref, mm2b_ref, mv2b_ref = _reference_batch_norm_2d(
        x2b, ones2b, zeros2b, zeros2b, zeros2b)
    assert jnp.allclose(y2b, y2b_ref, atol=1e-4, rtol=1e-4)
    assert jnp.allclose(mm2b, mm2b_ref, atol=1e-5, rtol=1e-5)
    assert jnp.allclose(mv2b, mv2b_ref, atol=1e-5, rtol=1e-5)

    print("KERNEL_OK")
</pallas_src>

<mosaic_0001>
module attributes {stable_mosaic.version = 11 : i64} {
  func.func @_bn_fused_kernel_4d(%arg0: i32, %arg1: memref<2x4x256xf32, #tpu.memory_space<vmem>>, %arg2: memref<4x1xf32, #tpu.memory_space<vmem>>, %arg3: memref<4x1xf32, #tpu.memory_space<vmem>>, %arg4: memref<4x1xf32, #tpu.memory_space<vmem>>, %arg5: memref<4x1xf32, #tpu.memory_space<vmem>>, %arg6: memref<2x4x256xf32, #tpu.memory_space<vmem>>, %arg7: memref<4x1xf32, #tpu.memory_space<vmem>>, %arg8: memref<4x1xf32, #tpu.memory_space<vmem>>) attributes {dimension_semantics = [#tpu.dimension_semantics<parallel>], iteration_bounds = array<i64: 1>, scalar_prefetch = 0 : i64, scratch_operands = 0 : i64, tpu.core_type = #tpu.core_type<tc>, window_params = [{transform_indices = @transform_0, window_bounds = array<i64: 2, 4, 256>}, {transform_indices = @transform_1, window_bounds = array<i64: 4, 1>}, {transform_indices = @transform_2, window_bounds = array<i64: 4, 1>}, {transform_indices = @transform_3, window_bounds = array<i64: 4, 1>}, {transform_indices = @transform_4, window_bounds = array<i64: 4, 1>}, {transform_indices = @transform_5, window_bounds = array<i64: 2, 4, 256>}, {transform_indices = @transform_6, window_bounds = array<i64: 4, 1>}, {transform_indices = @transform_7, window_bounds = array<i64: 4, 1>}]} {
    %c0 = arith.constant 0 : index
    %c0_0 = arith.constant 0 : index
    %c0_1 = arith.constant 0 : index
    %0 = vector.load %arg1[%c0, %c0_0, %c0_1] : memref<2x4x256xf32, #tpu.memory_space<vmem>>, vector<2x4x256xf32>
    %cst = arith.constant dense<0.000000e+00> : vector<4x256xf32>
    %1 = vector.multi_reduction <add>, %0, %cst [0] : vector<2x4x256xf32> to vector<4x256xf32>
    %2 = arith.mulf %0, %0 : vector<2x4x256xf32>
    %cst_2 = arith.constant dense<0.000000e+00> : vector<4x256xf32>
    %3 = vector.multi_reduction <add>, %2, %cst_2 [0] : vector<2x4x256xf32> to vector<4x256xf32>
    %cst_3 = arith.constant dense<0.000000e+00> : vector<4xf32>
    %4 = vector.multi_reduction <add>, %1, %cst_3 [1] : vector<4x256xf32> to vector<4xf32>
    %5 = vector.shape_cast %4 : vector<4xf32> to vector<4x1xf32>
    %cst_4 = arith.constant 0.001953125 : f32
    %6 = vector.broadcast %cst_4 : f32 to vector<4x1xf32>
    %7 = arith.mulf %5, %6 : vector<4x1xf32>
    %cst_5 = arith.constant dense<0.000000e+00> : vector<4xf32>
    %8 = vector.multi_reduction <add>, %3, %cst_5 [1] : vector<4x256xf32> to vector<4xf32>
    %9 = vector.shape_cast %8 : vector<4xf32> to vector<4x1xf32>
    %cst_6 = arith.constant 0.001953125 : f32
    %10 = vector.broadcast %cst_6 : f32 to vector<4x1xf32>
    %11 = arith.mulf %9, %10 : vector<4x1xf32>
    %12 = arith.mulf %7, %7 : vector<4x1xf32>
    %13 = arith.subf %11, %12 : vector<4x1xf32>
    %cst_7 = arith.constant 9.99999974E-6 : f32
    %14 = vector.broadcast %cst_7 : f32 to vector<4x1xf32>
    %15 = arith.addf %13, %14 : vector<4x1xf32>
    %cst_8 = arith.constant 1.000000e+00 : f32
    %16 = vector.broadcast %cst_8 : f32 to vector<4x1xf32>
    %17 = arith.divf %16, %15 : vector<4x1xf32>
    %c0_9 = arith.constant 0 : index
    %c0_10 = arith.constant 0 : index
    %18 = vector.load %arg2[%c0_9, %c0_10] : memref<4x1xf32, #tpu.memory_space<vmem>>, vector<4x1xf32>
    %19 = arith.mulf %18, %17 : vector<4x1xf32>
    %c0_11 = arith.constant 0 : index
    %c0_12 = arith.constant 0 : index
    %20 = vector.load %arg3[%c0_11, %c0_12] : memref<4x1xf32, #tpu.memory_space<vmem>>, vector<4x1xf32>
    %21 = arith.mulf %7, %19 : vector<4x1xf32>
    %22 = arith.subf %20, %21 : vector<4x1xf32>
    %23 = vector.shape_cast %19 : vector<4x1xf32> to vector<1x4x1xf32>
    %24 = vector.broadcast %23 : vector<1x4x1xf32> to vector<2x4x256xf32>
    %25 = arith.mulf %0, %24 : vector<2x4x256xf32>
    %26 = vector.shape_cast %22 : vector<4x1xf32> to vector<1x4x1xf32>
    %27 = vector.broadcast %26 : vector<1x4x1xf32> to vector<2x4x256xf32>
    %28 = arith.addf %25, %27 : vector<2x4x256xf32>
    %c0_13 = arith.constant 0 : index
    %c0_14 = arith.constant 0 : index
    %c0_15 = arith.constant 0 : index
    %29 = vector.load %arg6[%c0_13, %c0_14, %c0_15] : memref<2x4x256xf32, #tpu.memory_space<vmem>>, vector<2x4x256xf32>
    tpu.vector_store %arg6[%c0_13, %c0_14, %c0_15], %28 {strides = array<i32>} : memref<2x4x256xf32, #tpu.memory_space<vmem>>, vector<2x4x256xf32>,
    %cst_16 = arith.constant 1.000000e-01 : f32
    %30 = vector.broadcast %cst_16 : f32 to vector<4x1xf32>
    %31 = arith.mulf %30, %7 : vector<4x1xf32>
    %c0_17 = arith.constant 0 : index
    %c0_18 = arith.constant 0 : index
    %32 = vector.load %arg4[%c0_17, %c0_18] : memref<4x1xf32, #tpu.memory_space<vmem>>, vector<4x1xf32>
    %cst_19 = arith.constant 0.899999976 : f32
    %33 = vector.broadcast %cst_19 : f32 to vector<4x1xf32>
    %34 = arith.mulf %33, %32 : vector<4x1xf32>
    %35 = arith.addf %31, %34 : vector<4x1xf32>
    %c0_20 = arith.constant 0 : index
    %c0_21 = arith.constant 0 : index
    %36 = vector.load %arg7[%c0_20, %c0_21] : memref<4x1xf32, #tpu.memory_space<vmem>>, vector<4x1xf32>
    tpu.vector_store %arg7[%c0_20, %c0_21], %35 {strides = array<i32>} : memref<4x1xf32, #tpu.memory_space<vmem>>, vector<4x1xf32>,
    %cst_22 = arith.constant 1.000000e-01 : f32
    %37 = vector.broadcast %cst_22 : f32 to vector<4x1xf32>
    %38 = arith.mulf %37, %13 : vector<4x1xf32>
    %c0_23 = arith.constant 0 : index
    %c0_24 = arith.constant 0 : index
    %39 = vector.load %arg5[%c0_23, %c0_24] : memref<4x1xf32, #tpu.memory_space<vmem>>, vector<4x1xf32>
    %cst_25 = arith.constant 0.899999976 : f32
    %40 = vector.broadcast %cst_25 : f32 to vector<4x1xf32>
    %41 = arith.mulf %40, %39 : vector<4x1xf32>
    %42 = arith.addf %38, %41 : vector<4x1xf32>
    %c0_26 = arith.constant 0 : index
    %c0_27 = arith.constant 0 : index
    %43 = vector.load %arg8[%c0_26, %c0_27] : memref<4x1xf32, #tpu.memory_space<vmem>>, vector<4x1xf32>
    tpu.vector_store %arg8[%c0_26, %c0_27], %42 {strides = array<i32>} : memref<4x1xf32, #tpu.memory_space<vmem>>, vector<4x1xf32>,
    return
  }
  func.func @transform_0(%arg0: i32) -> (i32, i32, i32) {
    %c0_i32 = arith.constant 0 : i32
    %c0_i32_0 = arith.constant 0 : i32
    %c0_i32_1 = arith.constant 0 : i32
    return %c0_i32, %arg0, %c0_i32_0 : i32, i32, i32
  }
  func.func @transform_1(%arg0: i32) -> (i32, i32) {
    %c0_i32 = arith.constant 0 : i32
    %c0_i32_0 = arith.constant 0 : i32
    return %arg0, %c0_i32 : i32, i32
  }
  func.func @transform_2(%arg0: i32) -> (i32, i32) {
    %c0_i32 = arith.constant 0 : i32
    %c0_i32_0 = arith.constant 0 : i32
    return %arg0, %c0_i32 : i32, i32
  }
  func.func @transform_3(%arg0: i32) -> (i32, i32) {
    %c0_i32 = arith.constant 0 : i32
    %c0_i32_0 = arith.constant 0 : i32
    return %arg0, %c0_i32 : i32, i32
  }
  func.func @transform_4(%arg0: i32) -> (i32, i32) {
    %c0_i32 = arith.constant 0 : i32
    %c0_i32_0 = arith.constant 0 : i32
    return %arg0, %c0_i32 : i32, i32
  }
  func.func @transform_5(%arg0: i32) -> (i32, i32, i32) {
    %c0_i32 = arith.constant 0 : i32
    %c0_i32_0 = arith.constant 0 : i32
    %c0_i32_1 = arith.constant 0 : i32
    return %c0_i32, %arg0, %c0_i32_0 : i32, i32, i32
  }
  func.func @transform_6(%arg0: i32) -> (i32, i32) {
    %c0_i32 = arith.constant 0 : i32
    %c0_i32_0 = arith.constant 0 : i32
    return %arg0, %c0_i32 : i32, i32
  }
  func.func @transform_7(%arg0: i32) -> (i32, i32) {
    %c0_i32 = arith.constant 0 : i32
    %c0_i32_0 = arith.constant 0 : i32
    return %arg0, %c0_i32 : i32, i32
  }
}

</mosaic_0001>

<bundles_post_ra>
// kernel: _bn_forward_4d.1
= control target key start
LH: loop header
LB: loop body
LE: loop exit
PB: predicated region body
PF: predicated region fallthrough
CT: control target
= control target key end

     0   :  { %vm31_vm0 = vcmask 1043456   ;;  %v135_v26 = vmov 0   ;;  %vm108_vm1 = vcmask 3072   ;;  %v136_v48 = vmov 839922192   ;;  %s235_s0 = inlined_call_operand.vmem [shape: f32[2,4,256], index: 0, kind: input, shape index: {}]   ;;  %s236_s3 = inlined_call_operand.vmem [shape: f32[4,1], index: 3, kind: input, shape index: {}]   ;;  %s237_s4 = inlined_call_operand.vmem [shape: f32[4,1], index: 4, kind: input, shape index: {}]   ;;  %s238_s6 = inlined_call_operand.vmem [shape: f32[4,1], index: 6, kind: output, shape index: {1}]   ;;  %s239_s7 = inlined_call_operand.vmem [shape: f32[4,1], index: 7, kind: output, shape index: {2}]   ;;  %s240_s1 = inlined_call_operand.vmem [shape: f32[4,1], index: 1, kind: input, shape index: {}]   ;;  %s241_s2 = inlined_call_operand.vmem [shape: f32[4,1], index: 2, kind: input, shape index: {}]   ;;  %s242_s5 = inlined_call_operand.vmem [shape: f32[2,4,256], index: 5, kind: output, shape index: {0}]  }
   0x1   :  { %v180_v0 = vld [vmem:[%s235_s0] sm:$0xff]  ;;  %v185_v1 = vld [vmem:[%s235_s0 + $0x8] sm:$0xff]  ;;  %129 = vset.pattern.permute.xlu1 %v135_v26  ;;  %130 = vset.pattern.permute.xlu0 %v135_v26  ;;  %v79_v49 = vunpack.c.l.s4 %v136_v48  ;;  %v81_v50 = vlaneseq }
   0x2   :  { %v27_v2 = vcombine.high %v180_v0, %v180_v0  ;;  %v28_v3 = vcombine.high %v185_v1, %v185_v1  ;;  %v32_v4 = vsel %vm31_vm0, %v180_v0, 0.0  ;;  %v33_v5 = vsel %vm31_vm0, %v185_v1, 0.0  ;;  %v105_v27 = vld [vmem:[%s236_s3] sm:$0xf] }
   0x3   :  { %v34_v6 = vadd.f32 %v33_v5, %v32_v4  ;;  %v38_v7 = vmul.f32 %v180_v0, %v180_v0  ;;  %v39_v8 = vmul.f32 %v185_v1, %v185_v1  ;;  %v106_v29 = vmul.f32 0.9, %v105_v27  ;;  %v111_v32 = vld [vmem:[%s237_s4] sm:$0xf] }
   0x4   :  { %v35_v9 = vsel %vm31_vm0, %v27_v2, 0.0  ;;  %v36_v10 = vsel %vm31_vm0, %v28_v3, 0.0  ;;  %v112_v37 = vmul.f32 0.9, %v111_v32  ;;  %v69_v42 = vld [vmem:[%s240_s1] sm:$0xf]  ;;  %v80_v51 = vunpack.c.0.s8 %v79_v49 }
   0x5   :  { %v37_v11 = vadd.f32 %v36_v10, %v35_v9  ;;  %v52_v12 = vsel %vm31_vm0, %v34_v6, 0.0  ;;  %v42_v13 = vcombine.high %v38_v7, %v38_v7  ;;  %v43_v14 = vcombine.high %v39_v8, %v39_v8  ;;  %v71_v45 = vld [vmem:[%s241_s2] sm:$0xf] }
   0x6   :  { %v46_v15 = vsel %vm31_vm0, %v38_v7, 0.0  ;;  %v47_v16 = vsel %vm31_vm0, %v39_v8, 0.0  ;;  %v82_v52 = vshrl.u32 %v81_v50, 7 }
   0x7   :  { %v53_v17 = vsel %vm31_vm0, %v37_v11, 0.0  ;;  %v48_v18 = vadd.f32 %v47_v16, %v46_v15  ;;  %v49_v19 = vsel %vm31_vm0, %v42_v13, 0.0  ;;  %v50_v20 = vsel %vm31_vm0, %v43_v14, 0.0 }
   0x8   :  { %v54_v21 = vadd.f32 %v53_v17, %v52_v12  ;;  %v51_v22 = vadd.f32 %v50_v20, %v49_v19  ;;  %v83_v53 = vsub.s32 %v80_v51, %v82_v52 }
   0x9   :  { %v58_v23 = vsel %vm31_vm0, %v48_v18, 0.0 }
   0xa   :  { %55 = vadd.xlane.f32.xlu0 %v54_v21  ;;  %v59_v24 = vsel %vm31_vm0, %v51_v22, 0.0 }
   0xb   :  { %v60_v25 = vadd.f32 %v59_v24, %v58_v23 }
   0xe   :  { %61 = vadd.xlane.f32.xlu0 %v60_v25 }
  0x97   :  { %v56_v28 = vpop.xlane.xlu0 %55 }
  0x98   :  { %v57_v30 = vmul.f32 0.001953125, %v56_v28 }
  0x9a   :  { %v104_v31 = vmul.f32 0.1, %v57_v30  ;;  %v64_v35 = vmul.f32 %v57_v30, %v57_v30 }
  0x9b   :  { %v62_v33 = vpop.xlane.xlu0 %61 }
  0x9c   :  { %v107_v34 = vadd.f32 %v106_v29, %v104_v31  ;;  %v63_v36 = vmul.f32 0.001953125, %v62_v33 }
  0x9e   :  { %109 = vst.msk [vmem:[%s238_s6] sm:$0xf] %vm108_vm1, %v107_v34  ;;  %v65_v38 = vsub.f32 %v63_v36, %v64_v35 }
  0xa0   :  { %v66_v39 = vadd.f32 1e-05, %v65_v38  ;;  %v110_v40 = vmul.f32 0.1, %v65_v38 }
  0xa2   :  { %133 = vrcp.f32 %v66_v39  ;;  %v113_v41 = vadd.f32 %v112_v37, %v110_v40 }
  0xa4   :  { %114 = vst.msk [vmem:[%s239_s7] sm:$0xf] %vm108_vm1, %v113_v41 }
  0xac   :  { %v134_v43 = vpop.eup %133 }
  0xad   :  { %v70_v44 = vmul.f32 %v134_v43, %v69_v42 }
  0xaf   :  { %76 = vperm.xlu1 %129, %v70_v44   ;;  %v72_v46 = vmul.f32 %v70_v44, %v57_v30 }
  0xb1   :  { %v73_v47 = vsub.f32 %v71_v45, %v72_v46 }
  0xb3   :  { %90 = vperm.xlu1 %129, %v73_v47  }
 0x12e   :  { %v77_v54 = vpop.permute.xlu1 %76 }
 0x12f   :  { %v84_v55 = vrot.slane %v77_v54, %v83_v53 }
 0x131   :  { %v86_v57 = vmul.f32 %v84_v55, %v180_v0  ;;  %v87_v58 = vmul.f32 %v84_v55, %v185_v1 }
 0x132   :  { %v91_v56 = vpop.permute.xlu1 %90 }
 0x133   :  { %v98_v59 = vrot.slane %v91_v56, %v83_v53 }
 0x135   :  { %v100_v60 = vadd.f32 %v98_v59, %v86_v57  ;;  %v101_v61 = vadd.f32 %v98_v59, %v87_v58 }
 0x137   :  { %102 = vst [vmem:[%s242_s5] sm:$0xff] %v100_v60  ;;  %103 = vst [vmem:[%s242_s5 + $0x8] sm:$0xff] %v101_v61 }

</bundles_post_ra>
